<compile_context>
chip_gen: v7x
topology: tpu7x:2x2x1
jax: 0.10.0
libtpu: 0.0.40
codegen_flags: <defaults>
</compile_context>

<pallas_src>
import jax
import jax.numpy as jnp
from jax.experimental import pallas as pl
from jax.experimental.pallas import tpu as pltpu

_IN = 64          # input features
_HID = 10         # hidden features
_OUT = 10         # output features
_HID_PAD = 128    # lane-dense padded hidden width (intermediate only, never hits HBM)
_MAX_TILE = 8192  # batch rows per grid step for large B (multiple of 8)
_SMALL_BATCH = 1024  # below this, let XLA fuse the two tiny matmuls instead


def _round_up(n, m):
    return ((n + m - 1) // m) * m


def _fnn_kernel(x_ref, w1_ref, w2_ref, o_ref):
    # x_ref: (tile, 64)  w1_ref: (64, 128)  w2_ref: (128, 10)  o_ref: (tile, 10)
    # Both matmuls + ReLU fused; f32 accumulation on the MXU, ReLU on the VPU.
    # Default matmul precision matches the in-script XLA reference (same lowering family),
    # which the tolerance check below validates.
    h = jnp.dot(x_ref[...], w1_ref[...], preferred_element_type=jnp.float32)
    h = jnp.maximum(h, 0.0)
    y = jnp.dot(h, w2_ref[...], preferred_element_type=jnp.float32)
    o_ref[...] = y.astype(o_ref.dtype)


def prepare_weights(w1, w2):
    """Pad weights once at parameter-setup time (hoisted out of the per-call hot path).

    w1: [64, 10], w2: [10, 10]  (pre-transposed nn.Linear weights, y = x @ w).
    Returns w1p: [64, 128], w2p: [128, 10]. Padding is with exact zeros, so the first 10
    output columns are identical to the unpadded computation.
    """
    w1p = jnp.zeros((_IN, _HID_PAD), dtype=w1.dtype).at[:, :_HID].set(w1)
    w2p = jnp.zeros((_HID_PAD, _OUT), dtype=w2.dtype).at[:_HID, :].set(w2)
    return w1p, w2p


def minimal_fnn(x, w1p, w2p, *, force_pallas=False):
    """relu(x @ w1) @ w2 for x: [B, 64] -> [B, 10], using padded weights from prepare_weights."""
    B = x.shape[0]
    dtype = x.dtype

    # Small-batch bail-out: a standalone pallas_call (launch + pipeline ramp, single-step
    # grid) loses to letting XLA fuse these two tiny matmuls into the surrounding graph.
    if B < _SMALL_BATCH and not force_pallas:
        h = jnp.maximum(jnp.dot(x, w1p), 0.0)
        return jnp.dot(h, w2p).astype(dtype)

    if B > _MAX_TILE:
        tile = _MAX_TILE
    else:
        # Split into >= 2 tiles (multiples of 8) so the "parallel" batch axis can be
        # sharded across v7x's two TensorCores (no effect on single-TC v5e/v6e).
        tile = max(8, _round_up((B + 1) // 2, 8))
    grid = (pl.cdiv(B, tile),)

    return pl.pallas_call(
        _fnn_kernel,
        out_shape=jax.ShapeDtypeStruct((B, _OUT), dtype),
        grid_spec=pltpu.PrefetchScalarGridSpec(
            num_scalar_prefetch=0,
            grid=grid,
            in_specs=[
                pl.BlockSpec((tile, _IN), lambda i: (i, 0)),       # x streams per batch tile
                pl.BlockSpec((_IN, _HID_PAD), lambda i: (0, 0)),   # W1 resident in VMEM
                pl.BlockSpec((_HID_PAD, _OUT), lambda i: (0, 0)),  # W2 resident in VMEM
            ],
            # Narrow (tile, 10) output block: 10 equals the full last dim (legal), and HBM
            # writeback is 40 B/row instead of 512 B/row; no wrapper slice needed.
            out_specs=pl.BlockSpec((tile, _OUT), lambda i: (i, 0)),
        ),
        compiler_params=pltpu.CompilerParams(
            dimension_semantics=("parallel",),  # megacore / v7x dual-TC sharding of batch tiles
            vmem_limit_bytes=32 << 20,          # kernel needs only a few MiB; keep v7x headroom
        ),
    )(x, w1p, w2p)


def reference_fnn(x, w1, w2):
    return jnp.maximum(jnp.dot(x, w1), 0.0) @ w2


if __name__ == "__main__":
    key = jax.random.PRNGKey(0)
    k_x1, k_x2, k_w1, k_w2 = jax.random.split(key, 4)

    # Deterministic parameter init matching nn.Linear shapes:
    #   hidden.weight: [10, 64] -> stored transposed as w1 [64, 10]
    #   output.weight: [10, 10] -> stored transposed as w2 [10, 10]
    bound1 = 1.0 / float(jnp.sqrt(jnp.float32(_IN)))
    bound2 = 1.0 / float(jnp.sqrt(jnp.float32(_HID)))
    w1 = jax.random.uniform(k_w1, (_IN, _HID), dtype=jnp.float32, minval=-bound1, maxval=bound1)
    w2 = jax.random.uniform(k_w2, (_HID, _OUT), dtype=jnp.float32, minval=-bound2, maxval=bound2)
    w1p, w2p = prepare_weights(w1, w2)  # padded once, reused for every call

    # 1) Tiny batch forced through the Pallas kernel (single-tile grid).
    B_small = 8
    x_small = jax.random.normal(k_x1, (B_small, _IN), dtype=jnp.float32)
    out_small = jax.block_until_ready(minimal_fnn(x_small, w1p, w2p, force_pallas=True))
    ref_small = reference_fnn(x_small, w1, w2)
    assert out_small.shape == (B_small, _OUT), out_small.shape
    assert jnp.allclose(out_small, ref_small, atol=1e-5, rtol=1e-5), "pallas (small B) mismatch"

    # Tiny batch through the default XLA fallback path.
    out_fb = jax.block_until_ready(minimal_fnn(x_small, w1p, w2p))
    assert jnp.allclose(out_fb, ref_small, atol=1e-5, rtol=1e-5), "fallback mismatch"

    # 2) Larger batch exercising the multi-step pipelined grid (2 x 1024-row tiles).
    B = 2048
    x = jax.random.normal(k_x2, (B, _IN), dtype=jnp.float32)
    out = jax.block_until_ready(minimal_fnn(x, w1p, w2p))
    ref = reference_fnn(x, w1, w2)
    assert out.shape == (B, _OUT), out.shape
    assert jnp.allclose(out, ref, atol=1e-5, rtol=1e-5), "pallas (large B) mismatch"

    print("KERNEL_OK")
</pallas_src>

<mosaic_0001>
module attributes {stable_mosaic.version = 11 : i64} {
  func.func @_fnn_kernel(%arg0: i32, %arg1: memref<8x64xf32, #tpu.memory_space<vmem>>, %arg2: memref<64x128xf32, #tpu.memory_space<vmem>>, %arg3: memref<128x10xf32, #tpu.memory_space<vmem>>, %arg4: memref<8x10xf32, #tpu.memory_space<vmem>>) attributes {dimension_semantics = [#tpu.dimension_semantics<parallel>], iteration_bounds = array<i64: 1>, scalar_prefetch = 0 : i64, scratch_operands = 0 : i64, tpu.core_type = #tpu.core_type<tc>, window_params = [{transform_indices = @transform_0, window_bounds = array<i64: 8, 64>}, {pipeline_mode = #tpu.pipeline_mode<synchronous>, transform_indices = @transform_1, window_bounds = array<i64: 64, 128>}, {pipeline_mode = #tpu.pipeline_mode<synchronous>, transform_indices = @transform_2, window_bounds = array<i64: 128, 10>}, {transform_indices = @transform_3, window_bounds = array<i64: 8, 10>}]} {
    %c0 = arith.constant 0 : index
    %c0_0 = arith.constant 0 : index
    %0 = vector.load %arg1[%c0, %c0_0] : memref<8x64xf32, #tpu.memory_space<vmem>>, vector<8x64xf32>
    %c0_1 = arith.constant 0 : index
    %c0_2 = arith.constant 0 : index
    %1 = vector.load %arg2[%c0_1, %c0_2] : memref<64x128xf32, #tpu.memory_space<vmem>>, vector<64x128xf32>
    %cst = arith.constant dense<0.000000e+00> : vector<8x128xf32>
    %2 = tpu.matmul %0, %1, %cst {dimension_numbers = #tpu.dot_dimension_numbers<[1], [0], [0], [1], [0, 0, 1, 1], [], []>} : vector<8x64xf32>, vector<64x128xf32>, vector<8x128xf32> -> vector<8x128xf32>
    %cst_3 = arith.constant 0.000000e+00 : f32
    %3 = vector.broadcast %cst_3 : f32 to vector<8x128xf32>
    %4 = arith.maximumf %2, %3 : vector<8x128xf32>
    %c0_4 = arith.constant 0 : index
    %c0_5 = arith.constant 0 : index
    %5 = vector.load %arg3[%c0_4, %c0_5] : memref<128x10xf32, #tpu.memory_space<vmem>>, vector<128x10xf32>
    %cst_6 = arith.constant dense<0.000000e+00> : vector<8x10xf32>
    %6 = tpu.matmul %4, %5, %cst_6 {dimension_numbers = #tpu.dot_dimension_numbers<[1], [0], [0], [1], [0, 0, 1, 1], [], []>} : vector<8x128xf32>, vector<128x10xf32>, vector<8x10xf32> -> vector<8x10xf32>
    %c0_7 = arith.constant 0 : index
    %c0_8 = arith.constant 0 : index
    %7 = vector.load %arg4[%c0_7, %c0_8] : memref<8x10xf32, #tpu.memory_space<vmem>>, vector<8x10xf32>
    tpu.vector_store %arg4[%c0_7, %c0_8], %6 {strides = array<i32>} : memref<8x10xf32, #tpu.memory_space<vmem>>, vector<8x10xf32>,
    return
  }
  func.func @transform_0(%arg0: i32) -> (i32, i32) {
    %c0_i32 = arith.constant 0 : i32
    %c0_i32_0 = arith.constant 0 : i32
    return %arg0, %c0_i32 : i32, i32
  }
  func.func @transform_1(%arg0: i32) -> (i32, i32) {
    %c0_i32 = arith.constant 0 : i32
    %c0_i32_0 = arith.constant 0 : i32
    %c0_i32_1 = arith.constant 0 : i32
    return %c0_i32, %c0_i32_0 : i32, i32
  }
  func.func @transform_2(%arg0: i32) -> (i32, i32) {
    %c0_i32 = arith.constant 0 : i32
    %c0_i32_0 = arith.constant 0 : i32
    %c0_i32_1 = arith.constant 0 : i32
    return %c0_i32, %c0_i32_0 : i32, i32
  }
  func.func @transform_3(%arg0: i32) -> (i32, i32) {
    %c0_i32 = arith.constant 0 : i32
    %c0_i32_0 = arith.constant 0 : i32
    return %arg0, %c0_i32 : i32, i32
  }
}

</mosaic_0001>

<bundles_post_ra>
// kernel: tpu_custom_call.1
= control target key start
LH: loop header
LB: loop body
LE: loop exit
PB: predicated region body
PF: predicated region fallthrough
CT: control target
= control target key end

     0   :  { %v346_v3 = vmov 0.0|0.0   ;;  %vm347_vm0 = vmmov 0   ;;  %v348_v6 = vmov 0.0   ;;  %s457_s0 = inlined_call_operand.vmem [shape: f32[8,64], index: 0, kind: input, shape index: {}]   ;;  %s458_s1 = inlined_call_operand.vmem [shape: f32[64,128], index: 1, kind: input, shape index: {}]   ;;  %s459_s2 = inlined_call_operand.vmem [shape: f32[128,10], index: 2, kind: input, shape index: {}]   ;;  %s460_s3 = inlined_call_operand.hbm [shape: f32[8,10], index: 3, kind: output, shape index: {}]  }
   0x1   :  { %v16_v0 = vld [vmem:[%s458_s1] sm:$0xff]  ;;  %v17_v1 = vld [vmem:[%s458_s1 + $0x8] sm:$0xff]  ;;  %v18_v2 = vld [vmem:[%s458_s1 + $0x10] sm:$0xff]  ;;  %282 = vmatprep.subr.bf16.mxu0 %v346_v3  ;;  %244 = vmatprep.mubr.msk.f32.mxu0 %vm347_vm0, %v348_v6 }
   0x2   :  { %v283_v4 = vpack.c.bf16 %v17_v1, %v16_v0  ;;  %v19_v5 = vld [vmem:[%s458_s1 + $0x18] sm:$0xff]  ;;  %294 = vmatprep.subr.bf16.mxu1 %v346_v3  ;;  %279 = vmatprep.mubr.msk.f32.mxu1 %vm347_vm0, %v348_v6  ;;  %v99_v8 = vld [vmem:[%s459_s2] sm:$0xff]  ;;  %v100_v9 = vld [vmem:[%s459_s2 + $0x8] sm:$0xff] }
   0x3   :  { %v286_v7 = vpack.c.bf16 %v19_v5, %v18_v2  ;;  %v101_v10 = vld [vmem:[%s459_s2 + $0x10] sm:$0xff]  ;;  %v20_v11 = vld [vmem:[%s458_s1 + $0x20] sm:$0xff]  ;;  %v21_v12 = vld [vmem:[%s458_s1 + $0x28] sm:$0xff]  ;;  %v295_v13 = vpack.c.bf16 %v100_v9, %v99_v8 }
   0x4   :  { %284 = vmatpush3.bf16.msra.mxu0 %v283_v4  ;;  %v102_v14 = vld [vmem:[%s459_s2 + $0x18] sm:$0xff]  ;;  %v289_v16 = vpack.c.bf16 %v21_v12, %v20_v11  ;;  %v103_v17 = vld [vmem:[%s459_s2 + $0x20] sm:$0xff]  ;;  %v104_v18 = vld [vmem:[%s459_s2 + $0x28] sm:$0xff] }
   0x5   :  { %285 = vmatprep.subr.bf16.mxu0 %v346_v3  ;;  %296 = vmatpush3.bf16.msra.mxu1 %v295_v13  ;;  %v298_v15 = vpack.c.bf16 %v102_v14, %v101_v10 }
   0x6   :  { %297 = vmatprep.subr.bf16.mxu1 %v346_v3 }
   0x8   :  { %287 = vmatpush3.bf16.msra.mxu0 %v286_v7 }
   0x9   :  { %8 = vsyncpa [#allocation3], 0  ;;  %288 = vmatprep.subr.bf16.mxu0 %v346_v3  ;;  %v22_v19 = vld [vmem:[%s458_s1 + $0x30] sm:$0xff]  ;;  %v23_v20 = vld [vmem:[%s458_s1 + $0x38] sm:$0xff]  ;;  %299 = vmatpush3.bf16.msra.mxu1 %v298_v15  ;;  %v301_v21 = vpack.c.bf16 %v104_v18, %v103_v17  ;;  %vm24_vm1 = vcmask 523264   ;;  %s349_s6 = smov [#allocation2]  }
   0xa   :  { %v292_v22 = vpack.c.bf16 %v23_v20, %v22_v19  ;;  %300 = vmatprep.subr.bf16.mxu1 %v346_v3  ;;  %v105_v23 = vld [vmem:[%s459_s2 + $0x30] sm:$0xff]  ;;  %v106_v24 = vld [vmem:[%s459_s2 + $0x38] sm:$0xff]  ;;  %v15_v26 = vld [vmem:[%s457_s0] sm:$0xff]  ;;  %s193_s7 = sshll.u32 %s349_s6, 4  ;;  %vm185_vm2 = vcmask 80896   ;;  %s194_s7 = int_to_ptr.vmem [resolvable:$true] %s193_s7 }
   0xb   :  { %v304_v25 = vpack.c.bf16 %v106_v24, %v105_v23  ;;  %v107_v27 = vld [vmem:[%s459_s2 + $0x40] sm:$0xff]  ;;  %v108_v28 = vld [vmem:[%s459_s2 + $0x48] sm:$0xff]  ;;  %v109_v30 = vld [vmem:[%s459_s2 + $0x50] sm:$0xff]  ;;  %s322_s8 = scalar_lea.vmem %s194_s7, 128  ;;  %p327_p1 = scmp.lt.s32.totalorder %s194_s7, %s194_s7 }
   0xc   :  { %290 = vmatpush3.bf16.msra.mxu0 %v289_v16  ;;  %v307_v29 = vpack.c.bf16 %v108_v28, %v107_v27  ;;  %v110_v31 = vld [vmem:[%s459_s2 + $0x58] sm:$0xff]  ;;  %v111_v33 = vld [vmem:[%s459_s2 + $0x60] sm:$0xff]  ;;  %v112_v34 = vld [vmem:[%s459_s2 + $0x68] sm:$0xff]  ;;  %p323_p0 = scmp.ne.s32.totalorder %s194_s7, %s322_s8  ;;  %p328_p2 = scmp.lt.s32.totalorder %s322_s8, %s322_s8 }
   0xd   :  { %291 = vmatprep.subr.bf16.mxu0 %v346_v3  ;;  %302 = vmatpush3.bf16.msra.mxu1 %v301_v21  ;;  %v310_v32 = vpack.c.bf16 %v110_v31, %v109_v30  ;;  %v313_v35 = vpack.c.bf16 %v112_v34, %v111_v33  ;;  %v113_v36 = vld [vmem:[%s459_s2 + $0x70] sm:$0xff]  ;;  %v114_v37 = vld [vmem:[%s459_s2 + $0x78] sm:$0xff] }
   0xe   :  { %303 = vmatprep.subr.bf16.mxu1 %v346_v3  ;;  %v316_v38 = vpack.c.bf16 %v114_v37, %v113_v36  ;;  %p329_p3 = por %p328_p2, %p327_p1 }
  0x10   :  { %293 = vmatpush3.bf16.msra.mxu0 %v292_v22  ;;  %p330_p4 = pnand %p329_p3, %p323_p0 }
  0x11   :  { %305 = vmatpush3.bf16.msra.mxu1 %v304_v25 }
  0x12   :  { %306 = vmatprep.subr.bf16.mxu1 %v346_v3 }
  0x13   :  { %245 = vmatmul.mubr.msk.f32.vlgmr.msra.gmra.mrb[0].mxu0 %vm24_vm1, %v15_v26 }
  0x15   :  { %308 = vmatpush3.bf16.msra.mxu1 %v307_v29 }
  0x16   :  { %309 = vmatprep.subr.bf16.mxu1 %v346_v3 }
  0x19   :  { %311 = vmatpush3.bf16.msra.mxu1 %v310_v32 }
  0x1a   :  { %312 = vmatprep.subr.bf16.mxu1 %v346_v3 }
  0x1d   :  { %314 = vmatpush3.bf16.msra.mxu1 %v313_v35 }
  0x1e   :  { %315 = vmatprep.subr.bf16.mxu1 %v346_v3 }
  0x21   :  { %317 = vmatpush3.bf16.msra.mxu1 %v316_v38 }
  0xe6   :  { %v94_v39 = vpop.f32.mrb[0].mxu0 }
  0xe7   :  { %v98_v40 = vmax.f32 %v94_v39, 0.0  ;;  %v246_v41 = vpop.f32.mrb[1].mxu0 }
  0xe9   :  { %280 = vmatmul.mubr.f32.vlgmr.msra.gmra.mrb[0].mxu1 %v98_v40 }
 0x1bc   :  { %v181_v42 = vpop.f32.mrb[0].mxu1 }
 0x1bd   :  { %186 = vst.msk [vmem:[#allocation2] sm:$0xff] %vm185_vm2, %v181_v42  ;;  %v281_v43 = vpop.f32.mrb[1].mxu1 }
 0x1be   :  { %333 = shalt.err (!%p330_p4)
}
 0x1bf   :  { %s334_s10 = scalar_lea.hbm %s460_s3, 128 }
 0x1c0   :  { %p335_p5 = scmp.ne.s32.totalorder %s460_s3, %s334_s10  ;;  %p338_p6 = scmp.lt.u32.totalorder %s334_s10, %s460_s3 }
 0x1c2   :  { %p340_p7 = pnand %p338_p6, %p335_p5 }
 0x1c4   :  { %343 = shalt.err (!%p340_p7)
}
 0x1c5   :  { %196 = dma.vmem_to_hbm [thread:$0]  %s194_s7, 128, %s460_s3, [#allocation3]  }
 0x1c6   :  { %344 = dma.done.wait [#allocation3], 128  }
 0x1c7   :  { %345 = vsyncadd [#allocation3], 4294967168 }
 0x1c8   :  { %200 = vsyncpa [#allocation3], 1 }

</bundles_post_ra>
